<compile_context>
chip_gen: v6e
topology: v6e:2x2x1
jax: 0.10.0
libtpu: 0.0.40
codegen_flags: <defaults>
</compile_context>

<pallas_src>
import jax
import jax.numpy as jnp
from jax.experimental import pallas as pl
from jax.experimental.pallas import tpu as pltpu


def _round_up(x, m):
    return (x + m - 1) // m * m


# ---------------------------------------------------------------------------
# Kernel: one batch tile per grid step.  All normalizations / head pre-folded.
# ---------------------------------------------------------------------------
def qnet_twin_duel_kernel(
    x_ref,                 # (TB, S)   batch tile of raw state
    w0_ref, b0_ref,        # (S, H0), (1, H0)   state-norm folded in
    w1h_ref, b1h_ref,      # (H0, A), (1, A)    2nd Linear + dueling head + value renorm folded in
    out_ref,               # (TB, A)
):
    h0 = jnp.dot(x_ref[...], w0_ref[...], preferred_element_type=jnp.float32) + b0_ref[...]
    h0 = jnp.maximum(h0, 0.0)
    out = jnp.dot(h0, w1h_ref[...], preferred_element_type=jnp.float32) + b1h_ref[...]
    out_ref[...] = out.astype(out_ref.dtype)


# ---------------------------------------------------------------------------
# One-time algebraic parameter fusion (outside the kernel, not per call).
# ---------------------------------------------------------------------------
def fuse_params(p):
    # (1) fold state normalization into the first Linear
    inv_std = 1.0 / p["state_std"]                          # (1, S)
    w0f = p["w0"] * inv_std.T                               # (S, H0)
    b0f = p["b0"] - (p["state_avg"] * inv_std) @ p["w0"]    # (1, H0)

    # (2) fold dueling combine (q_val - mean(q_val) + q_adv) + value renorm
    w_c = p["wval"] - jnp.mean(p["wval"], axis=1, keepdims=True) + p["wadv"]   # (H1, A)
    b_c = p["bval"] - jnp.mean(p["bval"]) + p["badv"][0, 0]                    # (1, A)
    vstd = p["value_std"][0, 0]
    vavg = p["value_avg"][0, 0]
    w_head = w_c * vstd                                     # (H1, A)
    b_head = b_c * vstd + vavg                              # (1, A)

    # (3) collapse the 2nd net_state Linear (no activation follows it) into
    #     the head:  s_enc @ W_head = (h0 @ W1 + b1) @ W_head
    w1h = p["w1"] @ w_head                                  # (H0, A)
    b1h = p["b1"] @ w_head + b_head                         # (1, A)

    return {"w0": w0f, "b0": b0f, "w1h": w1h, "b1h": b1h}


# ---------------------------------------------------------------------------
# Wrapper: batch-tiled grid, weights VMEM-resident across grid steps.
# ---------------------------------------------------------------------------
def qnet_twin_duel_forward(state, fused, *, block_b=1024):
    B, S = state.shape
    H0 = fused["w0"].shape[1]
    A = fused["w1h"].shape[1]

    # batch tile: multiple of 8 sublanes, capped at block_b rows
    TB = min(block_b, _round_up(B, 8))
    B_pad = _round_up(B, TB)
    if B_pad != B:
        state = jnp.pad(state, ((0, B_pad - B), (0, 0)))
    grid = (B_pad // TB,)

    def full(shape):
        # whole-array block, constant index -> fetched once, VMEM-resident
        return pl.BlockSpec(shape, lambda i: (0, 0))

    out = pl.pallas_call(
        qnet_twin_duel_kernel,
        out_shape=jax.ShapeDtypeStruct((B_pad, A), jnp.float32),
        grid=grid,
        in_specs=[
            pl.BlockSpec((TB, S), lambda i: (i, 0)),   # streamed batch tiles
            full((S, H0)), full((1, H0)),
            full((H0, A)), full((1, A)),
        ],
        out_specs=pl.BlockSpec((TB, A), lambda i: (i, 0)),
        compiler_params=pltpu.CompilerParams(
            dimension_semantics=("parallel",),         # shard batch tiles across TCs (v7x)
        ),
    )(state, fused["w0"], fused["b0"], fused["w1h"], fused["b1h"])

    return out[:B]


# ---------------------------------------------------------------------------
# Param construction mimicking the PyTorch module, and an unfused reference.
# ---------------------------------------------------------------------------
def _torch_linear_init(key, fan_in, fan_out):
    # PyTorch default Linear init: U(-1/sqrt(fan_in), 1/sqrt(fan_in))
    kw, kb = jax.random.split(key)
    bound = 1.0 / jnp.sqrt(float(fan_in))
    w = jax.random.uniform(kw, (fan_in, fan_out), jnp.float32, -bound, bound)  # (in, out)
    b = jax.random.uniform(kb, (1, fan_out), jnp.float32, -bound, bound)
    return w, b


def _orthogonal_head_init(key, fan_in, fan_out, std=0.1, bias_const=1e-6):
    w_out_in = jax.nn.initializers.orthogonal(scale=std)(key, (fan_out, fan_in), jnp.float32)
    w = jnp.transpose(w_out_in)                       # store as (in, out)
    b = jnp.full((1, fan_out), bias_const, jnp.float32)
    return w, b


def make_params(key, state_dim, dims, action_dim):
    k0, k1, kval, kadv = jax.random.split(key, 4)
    d0, d1 = dims
    w0, b0 = _torch_linear_init(k0, state_dim, d0)
    w1, b1 = _torch_linear_init(k1, d0, d1)
    wval, bval = _orthogonal_head_init(kval, d1, action_dim, std=0.1)
    wadv, badv = _orthogonal_head_init(kadv, d1, 1, std=0.1)
    return {
        "state_avg": jnp.zeros((1, state_dim), jnp.float32),
        "state_std": jnp.ones((1, state_dim), jnp.float32),
        "value_avg": jnp.zeros((1, 1), jnp.float32),
        "value_std": jnp.ones((1, 1), jnp.float32),
        "w0": w0, "b0": b0,
        "w1": w1, "b1": b1,
        "wval": wval, "bval": bval,
        "wadv": wadv, "badv": badv,
    }


def reference_forward(state, p):
    # direct, unfused transcription of QNetTwinDuel.forward
    x = (state - p["state_avg"]) / p["state_std"]
    h0 = jnp.maximum(x @ p["w0"] + p["b0"], 0.0)
    s_enc = h0 @ p["w1"] + p["b1"]
    q_val = s_enc @ p["wval"] + p["bval"]
    q_adv = s_enc @ p["wadv"] + p["badv"]
    value = q_val - jnp.mean(q_val, axis=1, keepdims=True) + q_adv
    return value * p["value_std"][0, 0] + p["value_avg"][0, 0]


if __name__ == "__main__":
    key = jax.random.PRNGKey(0)
    k_param, k_state = jax.random.split(key)

    batch = 8
    state_dim = 16
    dims = (32, 32)
    action_dim = 8

    params = make_params(k_param, state_dim, dims, action_dim)
    # non-trivial normalization stats so the folded normalization is exercised
    params["state_avg"] = 0.1 * jnp.arange(state_dim, dtype=jnp.float32)[None, :]
    params["state_std"] = 1.0 + 0.05 * jnp.arange(state_dim, dtype=jnp.float32)[None, :]
    params["value_avg"] = jnp.full((1, 1), 0.25, jnp.float32)
    params["value_std"] = jnp.full((1, 1), 2.0, jnp.float32)

    state = jax.random.normal(k_state, (batch, state_dim), jnp.float32)

    fused = fuse_params(params)
    out = qnet_twin_duel_forward(state, fused)
    out = jax.block_until_ready(out)

    ref = reference_forward(state, params)
    assert out.shape == (batch, action_dim)
    assert jnp.allclose(out, ref, atol=1e-4, rtol=1e-4), float(jnp.max(jnp.abs(out - ref)))

    print("KERNEL_OK")
</pallas_src>

<mosaic_0001>
module attributes {stable_mosaic.version = 11 : i64} {
  func.func @qnet_twin_duel_kernel(%arg0: i32, %arg1: memref<8x16xf32, #tpu.memory_space<vmem>>, %arg2: memref<16x32xf32, #tpu.memory_space<vmem>>, %arg3: memref<1x32xf32, #tpu.memory_space<vmem>>, %arg4: memref<32x8xf32, #tpu.memory_space<vmem>>, %arg5: memref<1x8xf32, #tpu.memory_space<vmem>>, %arg6: memref<8x8xf32, #tpu.memory_space<vmem>>) attributes {dimension_semantics = [#tpu.dimension_semantics<parallel>], iteration_bounds = array<i64: 1>, scalar_prefetch = 0 : i64, scratch_operands = 0 : i64, tpu.core_type = #tpu.core_type<tc>, window_params = [{transform_indices = @transform_0, window_bounds = array<i64: 8, 16>}, {pipeline_mode = #tpu.pipeline_mode<synchronous>, transform_indices = @transform_1, window_bounds = array<i64: 16, 32>}, {pipeline_mode = #tpu.pipeline_mode<synchronous>, transform_indices = @transform_2, window_bounds = array<i64: 1, 32>}, {pipeline_mode = #tpu.pipeline_mode<synchronous>, transform_indices = @transform_3, window_bounds = array<i64: 32, 8>}, {pipeline_mode = #tpu.pipeline_mode<synchronous>, transform_indices = @transform_4, window_bounds = array<i64: 1, 8>}, {transform_indices = @transform_5, window_bounds = array<i64: 8, 8>}]} {
    %c0 = arith.constant 0 : index
    %c0_0 = arith.constant 0 : index
    %0 = vector.load %arg1[%c0, %c0_0] : memref<8x16xf32, #tpu.memory_space<vmem>>, vector<8x16xf32>
    %c0_1 = arith.constant 0 : index
    %c0_2 = arith.constant 0 : index
    %1 = vector.load %arg2[%c0_1, %c0_2] : memref<16x32xf32, #tpu.memory_space<vmem>>, vector<16x32xf32>
    %cst = arith.constant dense<0.000000e+00> : vector<8x32xf32>
    %2 = tpu.matmul %0, %1, %cst {dimension_numbers = #tpu.dot_dimension_numbers<[1], [0], [0], [1], [0, 0, 1, 1], [], []>} : vector<8x16xf32>, vector<16x32xf32>, vector<8x32xf32> -> vector<8x32xf32>
    %c0_3 = arith.constant 0 : index
    %c0_4 = arith.constant 0 : index
    %3 = vector.load %arg3[%c0_3, %c0_4] : memref<1x32xf32, #tpu.memory_space<vmem>>, vector<1x32xf32>
    %4 = vector.broadcast %3 : vector<1x32xf32> to vector<8x32xf32>
    %5 = arith.addf %2, %4 : vector<8x32xf32>
    %cst_5 = arith.constant 0.000000e+00 : f32
    %6 = vector.broadcast %cst_5 : f32 to vector<8x32xf32>
    %7 = arith.maximumf %5, %6 : vector<8x32xf32>
    %c0_6 = arith.constant 0 : index
    %c0_7 = arith.constant 0 : index
    %8 = vector.load %arg4[%c0_6, %c0_7] : memref<32x8xf32, #tpu.memory_space<vmem>>, vector<32x8xf32>
    %cst_8 = arith.constant dense<0.000000e+00> : vector<8x8xf32>
    %9 = tpu.matmul %7, %8, %cst_8 {dimension_numbers = #tpu.dot_dimension_numbers<[1], [0], [0], [1], [0, 0, 1, 1], [], []>} : vector<8x32xf32>, vector<32x8xf32>, vector<8x8xf32> -> vector<8x8xf32>
    %c0_9 = arith.constant 0 : index
    %c0_10 = arith.constant 0 : index
    %10 = vector.load %arg5[%c0_9, %c0_10] : memref<1x8xf32, #tpu.memory_space<vmem>>, vector<1x8xf32>
    %11 = vector.broadcast %10 : vector<1x8xf32> to vector<8x8xf32>
    %12 = arith.addf %9, %11 : vector<8x8xf32>
    %c0_11 = arith.constant 0 : index
    %c0_12 = arith.constant 0 : index
    %13 = vector.load %arg6[%c0_11, %c0_12] : memref<8x8xf32, #tpu.memory_space<vmem>>, vector<8x8xf32>
    tpu.vector_store %arg6[%c0_11, %c0_12], %12 {strides = array<i32>} : memref<8x8xf32, #tpu.memory_space<vmem>>, vector<8x8xf32>,
    return
  }
  func.func @transform_0(%arg0: i32) -> (i32, i32) {
    %c0_i32 = arith.constant 0 : i32
    %c0_i32_0 = arith.constant 0 : i32
    return %arg0, %c0_i32 : i32, i32
  }
  func.func @transform_1(%arg0: i32) -> (i32, i32) {
    %c0_i32 = arith.constant 0 : i32
    %c0_i32_0 = arith.constant 0 : i32
    %c0_i32_1 = arith.constant 0 : i32
    return %c0_i32, %c0_i32_0 : i32, i32
  }
  func.func @transform_2(%arg0: i32) -> (i32, i32) {
    %c0_i32 = arith.constant 0 : i32
    %c0_i32_0 = arith.constant 0 : i32
    %c0_i32_1 = arith.constant 0 : i32
    return %c0_i32, %c0_i32_0 : i32, i32
  }
  func.func @transform_3(%arg0: i32) -> (i32, i32) {
    %c0_i32 = arith.constant 0 : i32
    %c0_i32_0 = arith.constant 0 : i32
    %c0_i32_1 = arith.constant 0 : i32
    return %c0_i32, %c0_i32_0 : i32, i32
  }
  func.func @transform_4(%arg0: i32) -> (i32, i32) {
    %c0_i32 = arith.constant 0 : i32
    %c0_i32_0 = arith.constant 0 : i32
    %c0_i32_1 = arith.constant 0 : i32
    return %c0_i32, %c0_i32_0 : i32, i32
  }
  func.func @transform_5(%arg0: i32) -> (i32, i32) {
    %c0_i32 = arith.constant 0 : i32
    %c0_i32_0 = arith.constant 0 : i32
    return %arg0, %c0_i32 : i32, i32
  }
}

</mosaic_0001>

<bundles_post_ra>
// kernel: tpu_custom_call.1
= control target key start
LH: loop header
LB: loop body
LE: loop exit
PB: predicated region body
PF: predicated region fallthrough
CT: control target
= control target key end

     0   :  { %v262_v1 = vmov 0.0   ;;  %vm263_vm0 = vmmov 0   ;;  %s325_s0 = inlined_call_operand.vmem [shape: f32[8,16], index: 0, kind: input, shape index: {}]   ;;  %s326_s1 = inlined_call_operand.vmem [shape: f32[16,32], index: 1, kind: input, shape index: {}]   ;;  %s327_s2 = inlined_call_operand.vmem [shape: f32[1,32], index: 2, kind: input, shape index: {}]   ;;  %s328_s3 = inlined_call_operand.vmem [shape: f32[32,8], index: 3, kind: input, shape index: {}]   ;;  %s329_s4 = inlined_call_operand.vmem [shape: f32[1,8], index: 4, kind: input, shape index: {}]   ;;  %s330_s5 = inlined_call_operand.hbm [shape: f32[8,8], index: 5, kind: output, shape index: {}]  }
   0x1   :  { %v23_v0 = vld [vmem:[%s326_s1 + $0x8] sm:$0xff]  ;;  %219 = vmatprep.subr.mxu0 %v262_v1  ;;  %v22_v2 = vld [vmem:[%s326_s1] sm:$0xff]  ;;  %223 = vmatprep.mubr.msk.f32.mxu0 %vm263_vm0, %v262_v1  ;;  %v109_v3 = vld [vmem:[%s328_s3 + $0x18] sm:$0xff] }
   0x2   :  { %10 = vsyncpa [#allocation3], 0  ;;  %220 = vmatpush3.msra.mxu0 %v23_v0  ;;  %v21_v4 = vld [vmem:[%s325_s0] sm:$0xff]  ;;  %vm31_vm1 = vcmask 130048   ;;  %226 = vmatprep.subr.mxu1 %v262_v1  ;;  %v108_v5 = vld [vmem:[%s328_s3 + $0x10] sm:$0xff]  ;;  %vm117_vm2 = vcmask 261120  }
   0x3   :  { %221 = vmatprep.subr.mxu0 %v262_v1  ;;  %227 = vmatpush3.msra.mxu1 %v109_v3  ;;  %v107_v6 = vld [vmem:[%s328_s3 + $0x8] sm:$0xff]  ;;  %v106_v7 = vld [vmem:[%s328_s3] sm:$0xff]  ;;  %s264_s9 = smov [#allocation2]   ;;  %vm191_vm3 = vcmask 64512  }
   0x4   :  { %222 = vmatpush3.msra.mxu0 %v22_v2  ;;  %228 = vmatprep.subr.mxu1 %v262_v1  ;;  %v207_v8 = vld [vmem:[%s327_s2] ss:$0 sm:$0xff]  ;;  %s199_s10 = sshll.u32 %s264_s9, 4  ;;  %s200_s10 = int_to_ptr.vmem [resolvable:$true] %s199_s10 }
   0x5   :  { %224 = vmatmul.mubr.msk.f32.vlgmr.msra.gmra.mxu0 %vm31_vm1, %v21_v4  ;;  %234 = vmatprep.mubr.msk.f32.mxu1 %vm263_vm0, %v262_v1  ;;  %v209_v13 = vld [vmem:[%s329_s4] ss:$0 sm:$0xff]  ;;  %s240_s3 = scalar_lea.vmem %s200_s10, 128  ;;  %p245_p1 = scmp.lt.s32.totalorder %s200_s10, %s200_s10 }
   0x6   :  { %229 = vmatpush3.msra.mxu1 %v108_v5  ;;  %p241_p0 = scmp.ne.s32.totalorder %s200_s10, %s240_s3  ;;  %p246_p2 = scmp.lt.s32.totalorder %s240_s3, %s240_s3 }
   0x7   :  { %230 = vmatprep.subr.mxu1 %v262_v1 }
   0x8   :  { %231 = vmatpush3.msra.mxu1 %v107_v6  ;;  %p247_p3 = por %p246_p2, %p245_p1 }
   0x9   :  { %232 = vmatprep.subr.mxu1 %v262_v1 }
   0xa   :  { %233 = vmatpush3.msra.mxu1 %v106_v7  ;;  %p248_p4 = pnand %p247_p3, %p241_p0 }
  0xc5   :  { %v101_v9 = vpop.f32.mrf.mxu0 }
  0xc6   :  { %v102_v10 = vadd.f32 %v207_v8, %v101_v9 }
  0xc7   :  { %v225_v11 = vpop.f32.mrf.mxu0 }
  0xc8   :  { %v105_v12 = vmax.f32 %v102_v10, 0.0 }
  0xca   :  { %235 = vmatmul.mubr.msk.f32.vlgmr.msra.gmra.mxu1 %vm117_vm2, %v105_v12 }
 0x18a   :  { %v187_v14 = vpop.f32.mrf.mxu1 }
 0x18b   :  { %v188_v15 = vadd.f32 %v209_v13, %v187_v14 }
 0x18c   :  { %v236_v16 = vpop.f32.mrf.mxu1 }
 0x18d   :  { %192 = vst.msk [vmem:[#allocation2] sm:$0xff] %vm191_vm3, %v188_v15 }
 0x18e   :  { %251 = shalt.err (!%p248_p4)
}
 0x18f   :  { %202 = dma.vmem_to_hbm [thread:$0]  %s200_s10, 128, %s330_s5, [#allocation3]  }
 0x190   :  { %260 = dma.done.wait [#allocation3], 128  }
 0x191   :  { %261 = vsyncadd [#allocation3], 4294967168 }
 0x192   :  { %206 = vsyncpa [#allocation3], 1 }

</bundles_post_ra>
